<compile_context>
chip_gen: v5e
topology: v5e:2x2
jax: 0.10.0
libtpu: 0.0.40
codegen_flags: <defaults>
</compile_context>

<pallas_src>
import jax
import jax.numpy as jnp
from jax.experimental import pallas as pl
from jax.experimental.pallas import tpu as pltpu

# Lane widths tried in order (largest multiple of 128 dividing the size wins).
_LANE_CANDIDATES = (1024, 512, 256, 128)
# Below this many elements a fused XLA add beats pallas_call dispatch overhead.
_SMALL_FALLBACK_ELEMS = 64 * 1024
# Per-ref block budget: keeps 3 refs x 2 buffers ~<= 24 MiB in VMEM.
_BLOCK_BUDGET_BYTES = 12 * 1024 * 1024


def _add_kernel(x_ref, y_ref, o_ref):
    # Cast inside the kernel (VPU work hidden under DMA) rather than in the
    # wrapper, which would materialize an extra HBM copy of the widened operand.
    o_ref[...] = x_ref[...].astype(o_ref.dtype) + y_ref[...].astype(o_ref.dtype)


def pallas_add(x, y):
    """Elementwise x + y (PyTorch `Add.forward`) via a tiled Pallas kernel."""
    x = jnp.asarray(x)
    y = jnp.asarray(y)

    out_dtype = jnp.promote_types(x.dtype, y.dtype)
    out_shape = jnp.broadcast_shapes(x.shape, y.shape)
    total = 1
    for d in out_shape:
        total *= int(d)

    # --- XLA-fallback regimes (zero extra HBM passes, already at roofline) ---
    #  * tiny / empty tensors: pallas_call dispatch + pipeline prologue dominates
    #  * genuine broadcasts: XLA fuses the broadcast into the add; feeding a
    #    materialized broadcast_to into a custom call would double the reads
    if (total < _SMALL_FALLBACK_ELEMS
            or tuple(x.shape) != tuple(out_shape)
            or tuple(y.shape) != tuple(out_shape)):
        return x + y

    # Largest lane width (multiple of 128) that divides the element count -> a
    # zero-copy reshape to a lane-dense slab with unmasked full-width stores.
    lane = next((l for l in _LANE_CANDIDATES if total % l == 0), None)
    if lane is None:
        # TODO(synk): a 1-D-blocked Pallas path could cover non-128-multiple
        # totals without padding; fused XLA is already at the 3N-byte roofline.
        return x + y

    rows = total // lane
    itemsizes = (x.dtype.itemsize + y.dtype.itemsize
                 + jnp.dtype(out_dtype).itemsize)

    # Row tile: ~4 MiB/ref (f32) budget, rounded down to a multiple of 8, and
    # capped at ceil(rows/2) (rounded up to 8) so the grid has >= 2 steps for
    # v7x's two TensorCores.  Trailing partial blocks are masked by Pallas.
    bytes_per_row = lane * itemsizes
    budget_rows = max(8, (_BLOCK_BUDGET_BYTES // bytes_per_row) // 8 * 8)
    half_rows = -(-rows // 2)
    half_rows = -(-half_rows // 8) * 8
    tr = min(budget_rows, half_rows, rows)
    grid = (pl.cdiv(rows, tr),)

    out2 = pl.pallas_call(
        _add_kernel,
        out_shape=jax.ShapeDtypeStruct((rows, lane), out_dtype),
        grid_spec=pltpu.PrefetchScalarGridSpec(
            num_scalar_prefetch=0,
            grid=grid,
            in_specs=[
                pl.BlockSpec((tr, lane), lambda i: (i, 0)),
                pl.BlockSpec((tr, lane), lambda i: (i, 0)),
            ],
            out_specs=pl.BlockSpec((tr, lane), lambda i: (i, 0)),
        ),
        compiler_params=pltpu.CompilerParams(
            # Single grid axis, "parallel" so v7x can shard it across its 2 TCs.
            dimension_semantics=("parallel",),
            # ~24 MiB double-buffered footprint; raise above v5e's 16 MiB scoped
            # default while staying well within every generation's VMEM.
            vmem_limit_bytes=32 * 1024 * 1024,
        ),
        # Pure-bandwidth op hint for XLA's scheduler around the custom call.
        cost_estimate=pl.CostEstimate(
            flops=total,
            transcendentals=0,
            bytes_accessed=total * itemsizes,
        ),
    )(x.reshape(rows, lane), y.reshape(rows, lane))

    return out2.reshape(out_shape)


if __name__ == "__main__":
    key = jax.random.PRNGKey(0)
    kx, ky = jax.random.split(key)

    # 1) Module-consistent small NCHW example (2,4,16,16): small-tensor path.
    x = jax.random.normal(kx, (2, 4, 16, 16), dtype=jnp.float32)
    y = jax.random.normal(ky, (2, 4, 16, 16), dtype=jnp.float32)
    out = pallas_add(x, y)
    jax.block_until_ready(out)
    assert out.shape == x.shape and out.dtype == x.dtype
    assert jnp.allclose(out, x + y, atol=1e-6, rtol=1e-6)

    # 2) Larger NCHW tensor: exercises the Pallas kernel (lane=1024, rows=128,
    #    tr=64 -> 2 grid steps so both v7x cores get work).
    a = jax.random.normal(kx, (2, 4, 128, 128), dtype=jnp.float32)
    b = jax.random.normal(ky, (2, 4, 128, 128), dtype=jnp.float32)
    out2 = pallas_add(a, b)
    jax.block_until_ready(out2)
    assert out2.shape == a.shape and out2.dtype == a.dtype
    assert jnp.allclose(out2, a + b, atol=1e-6, rtol=1e-6)

    # 3) Non-dividing row count (rows=520, tr=264 -> masked trailing block) with
    #    mixed dtypes (f32 + bf16): exercises the in-kernel cast.
    c = jax.random.normal(kx, (520, 1024), dtype=jnp.float32)
    d = jax.random.normal(ky, (520, 1024), dtype=jnp.bfloat16)
    out3 = pallas_add(c, d)
    jax.block_until_ready(out3)
    assert out3.dtype == jnp.float32
    assert jnp.allclose(out3, c + d, atol=1e-6, rtol=1e-6)

    # 4) Genuine broadcast (per-channel bias): fused-XLA fallback path.
    bias = jax.random.normal(ky, (1, 4, 1, 1), dtype=jnp.float32)
    out4 = pallas_add(a, bias)
    jax.block_until_ready(out4)
    assert out4.shape == a.shape
    assert jnp.allclose(out4, a + bias, atol=1e-6, rtol=1e-6)

    print("KERNEL_OK")
</pallas_src>

<mosaic_0001>
module attributes {stable_mosaic.version = 11 : i64} {
  func.func @_add_kernel(%arg0: i32, %arg1: memref<64x1024xf32, #tpu.memory_space<vmem>>, %arg2: memref<64x1024xf32, #tpu.memory_space<vmem>>, %arg3: memref<64x1024xf32, #tpu.memory_space<vmem>>) attributes {dimension_semantics = [#tpu.dimension_semantics<parallel>], iteration_bounds = array<i64: 2>, scalar_prefetch = 0 : i64, scratch_operands = 0 : i64, tpu.core_type = #tpu.core_type<tc>, window_params = [{transform_indices = @transform_0, window_bounds = array<i64: 64, 1024>}, {transform_indices = @transform_1, window_bounds = array<i64: 64, 1024>}, {transform_indices = @transform_2, window_bounds = array<i64: 64, 1024>}]} {
    %c0 = arith.constant 0 : index
    %c0_0 = arith.constant 0 : index
    %0 = vector.load %arg1[%c0, %c0_0] : memref<64x1024xf32, #tpu.memory_space<vmem>>, vector<64x1024xf32>
    %c0_1 = arith.constant 0 : index
    %c0_2 = arith.constant 0 : index
    %1 = vector.load %arg2[%c0_1, %c0_2] : memref<64x1024xf32, #tpu.memory_space<vmem>>, vector<64x1024xf32>
    %2 = arith.addf %0, %1 : vector<64x1024xf32>
    %c0_3 = arith.constant 0 : index
    %c0_4 = arith.constant 0 : index
    %3 = vector.load %arg3[%c0_3, %c0_4] : memref<64x1024xf32, #tpu.memory_space<vmem>>, vector<64x1024xf32>
    tpu.vector_store %arg3[%c0_3, %c0_4], %2 {strides = array<i32>} : memref<64x1024xf32, #tpu.memory_space<vmem>>, vector<64x1024xf32>,
    return
  }
  func.func @transform_0(%arg0: i32) -> (i32, i32) {
    %c0_i32 = arith.constant 0 : i32
    %c0_i32_0 = arith.constant 0 : i32
    return %arg0, %c0_i32 : i32, i32
  }
  func.func @transform_1(%arg0: i32) -> (i32, i32) {
    %c0_i32 = arith.constant 0 : i32
    %c0_i32_0 = arith.constant 0 : i32
    return %arg0, %c0_i32 : i32, i32
  }
  func.func @transform_2(%arg0: i32) -> (i32, i32) {
    %c0_i32 = arith.constant 0 : i32
    %c0_i32_0 = arith.constant 0 : i32
    return %arg0, %c0_i32 : i32, i32
  }
}

</mosaic_0001>

<bundles_post_ra>
// kernel: tpu_custom_call.1
= control target key start
LH: loop header
LB: loop body
LE: loop exit
PB: predicated region body
PF: predicated region fallthrough
CT: control target
= control target key end

     0   :  { %7 = vsyncpa [#allocation3], 0  ;;  %s1180_s0 = inlined_call_operand.hbm [shape: f32[128,1024], index: 0, kind: input, shape index: {}]   ;;  %s1181_s1 = inlined_call_operand.hbm [shape: f32[128,1024], index: 1, kind: input, shape index: {}]   ;;  %s1182_s2 = inlined_call_operand.hbm [shape: f32[128,1024], index: 2, kind: output, shape index: {}]  }
   0x1   :  { %9 = vsyncpa [#allocation3 + $0x1], 0 }
   0x2   :  { %10 = vsyncpa [#allocation6], 0 }
   0x3   :  { %12 = vsyncpa [#allocation6 + $0x1], 0 }
   0x4   :  { %13 = vsyncpa [#allocation4], 0 }
   0x5   :  { %15 = vsyncpa [#allocation4 + $0x1], 0  ;;  %s813_s9 = smov 0   ;;  %s815_s10 = smov 0  }
   0x6   :  { %s817_s11 = smov 0   ;;  %s819_s12 = smov 0  }
   0x7 LB: > { %s834_s13 = sadd.s32 4294967295, %s792_s12   ;;  %s580_s14 = sadd.s32 4294967294, %s792_s12   ;;  %s792_s12 = sphi %s819_s12, %s1193_s12   ;;  %s788_s11 = sphi %s817_s11, %s1192_s11   ;;  %s784_s10 = sphi %s815_s10, %s1191_s10   ;;  %s780_s9 = sphi %s813_s9, %s1190_s9  }
   0x8   : > { %s838_s15 = sadd.s32 1, %s792_s12   ;;  %s28_s16 = sadd.s32 1, %s788_s11 }
   0x9   : > { %s25_s17 = ssub.s32 %s792_s12, %s838_s15  ;;  %p35_p0 = scmp.ne.s32.totalorder %s788_s11, %s784_s10 }
   0xa   : > { %p26_p1 = scmp.eq.s32.totalorder %s25_s17, 0  ;;  %p36_p2 = scmp.eq.s32.totalorder %s792_s12, 0 }
   0xb   : > { %p41_p3 = scmp.ne.s32.totalorder %s784_s10, %s780_s9  ;;  %p42_p4 = scmp.eq.s32.totalorder %s834_s13, 0 }
   0xc   : > { %s850_s18 = scalar_select %p26_p1, %s788_s11, %s28_s16  }
   0xd   : > { %p852_p5 = por %p36_p2, %p35_p0  ;;  %p856_p6 = por %p42_p4, %p41_p3 }
   0xe   : > { %p91_p7 = scmp.eq.s32.totalorder %s834_s13, 1  ;;  %p97_p8 = scmp.eq.s32.totalorder %s580_s14, 1 }
   0xf   : > { %p624_p10 = scmp.lt.s32.totalorder %s792_s12, 2  ;;  %s872_s23 = sand.u32 1, %s788_s11  }
  0x10   : > { %p863_p11 = por %p91_p7, %p35_p0  ;;  %p867_p12 = por %p97_p8, %p41_p3 }
  0x11   : > { %s602_s24 = sshll.u32 %s792_s12, 9  ;;  %s583_s25 = sshll.u32 %s872_s23, 9 }
  0x12   : > { %s127_s28 = scalar_lea.hbm %s1180_s0, %s602_s24  ;;  %s121_s30 = scalar_lea.vmem [#allocation2], %s583_s25 }
  0x13   : > { %s128_s29 = sshll.u32 %s127_s28, 4  ;;  %s130_s3 = sshll.u32 %s121_s30, 4  ;;  %s129_s29 = int_to_ptr.hbm [resolvable:$true] %s128_s29  ;;  %s131_s3 = int_to_ptr.vmem [resolvable:$true] %s130_s3 }
  0x14   : > { %p885_p13 = pnand %p624_p10, %p852_p5  ;;  %p591_p0 = scmp.ge.s32.totalorder %s792_s12, 1 }
  0x15   : > { %p161_p1 = scmp.lt.s32.totalorder %s792_s12, 3  ;;  %s118_s5 = scalar_lea.sflag [#allocation3], %s872_s23 }
  0x16   : > { %s662_s6 = sshra.s32 %s129_s29, 4  ;;  %p666_p3 = pneg %p885_p13  ;;  %s663_s6 = int_to_ptr.hbm [resolvable:$true] %s662_s6 }
  0x17   : > { %s664_s7 = scalar_lea.hbm %s663_s6, 512  ;;  %s669_s16 = scalar_lea.hbm %s1180_s0, 1024 }
  0x18   : > { %p665_p2 = scmp.ne.s32.totalorder %s663_s6, %s664_s7  ;;  %p670_p5 = scmp.lt.s32.totalorder %s663_s6, %s1180_s0 }
  0x19   : > { %p671_p8 = scmp.lt.s32.totalorder %s669_s16, %s664_s7 }
  0x1a   : > { %p667_p4 = pnand %p666_p3, %p665_p2 }
  0x1b   : > { %p672_p10 = por %p671_p8, %p670_p5 }
  0x1c   : > { %p668_p7 = pneg %p667_p4 }
  0x1e   : > { %p673_p9 = pnand %p672_p10, %p668_p7 }
  0x20   : > { %676 = shalt.err (!%p673_p9)
}
  0x21   : > { %s794_s26 = smov 1024   ;;  %s795_s27 = smov 64  }
  0x22   : > { %616 = dma.hbm_to_vmem [thread:$0]  (!%p885_p13), %s129_s29, 8192, %s131_s3, %s118_s5, %s794_s26, %s794_s26, %s795_s27  }
  0x23   : > { %p909_p2 = pnand %p591_p0, %p161_p1  ;;  %s150_s7 = scalar_lea.hbm %s1181_s1, %s602_s24 }
  0x24   : > { %s151_s8 = sshll.u32 %s150_s7, 4  ;;  %s144_s14 = scalar_lea.vmem [#allocation5], %s583_s25  ;;  %s152_s8 = int_to_ptr.hbm [resolvable:$true] %s151_s8 }
  0x25   : > { %s153_s16 = sshll.u32 %s144_s14, 4  ;;  %s141_s17 = scalar_lea.sflag [#allocation6], %s872_s23  ;;  %s154_s16 = int_to_ptr.vmem [resolvable:$true] %s153_s16 }
  0x26   : > { %s692_s19 = sshra.s32 %s152_s8, 4  ;;  %s699_s30 = scalar_lea.hbm %s1181_s1, 1024  ;;  %s693_s19 = int_to_ptr.hbm [resolvable:$true] %s692_s19 }
  0x27   : > { %s694_s29 = scalar_lea.hbm %s693_s19, 512  ;;  %p700_p4 = scmp.lt.s32.totalorder %s693_s19, %s1181_s1 }
  0x28   : > { %p695_p9 = scmp.ne.s32.totalorder %s693_s19, %s694_s29  ;;  %p701_p7 = scmp.lt.s32.totalorder %s699_s30, %s694_s29 }
  0x2a   : > { %p697_p0 = pnand %p695_p9, %p666_p3  ;;  %p702_p5 = por %p701_p7, %p700_p4 }
  0x2c   : > { %p698_p1 = pneg %p697_p0 }
  0x2e   : > { %p703_p8 = pnand %p702_p5, %p698_p1 }
  0x30   : > { %706 = shalt.err (!%p703_p8)
}
  0x31   : > { %619 = dma.hbm_to_vmem [thread:$0]  (!%p885_p13), %s152_s8, 8192, %s154_s16, %s141_s17, %s794_s26, %s794_s26, %s795_s27  }
  0x32   : > { %165 = sbr.rel (%p909_p2) target bundleno = 129 (0x81), region = 28  ;;  %s935_s23 = sand.u32 (!%p909_p2), 1, %s784_s10  }
  0x33   : > { %s592_s25 = sshll.u32 (!%p909_p2), %s935_s23, 9  ;;  %s168_s7 = scalar_lea.sflag (!%p909_p2), [#allocation3], %s935_s23 }
  0x34   : > { %s939_s14 = scalar_lea.vmem (!%p909_p2), [#allocation2], %s592_s25 }
  0x37   : > { %767 = dma.done.wait (%p856_p6), %s168_s7, 8192  }
  0x38   : > { %769 = vsyncadd (%p856_p6), %s168_s7, 4294959104  ;;  %s178_s4 = scalar_lea.sflag [#allocation6], %s935_s23  ;;  %s946_s26 = scalar_lea.vmem [#allocation5], %s592_s25 }
  0x39   : > { %771 = dma.done.wait (%p856_p6), %s178_s4, 8192  }
  0x3a   : > { %773 = vsyncadd (%p856_p6), %s178_s4, 4294959104  ;;  %v211_v0 = vld [vmem:[%s939_s14] sm:$0xff]  ;;  %v212_v2 = vld [vmem:[%s939_s14 + $0x8] sm:$0xff]  ;;  %s961_s20 = scalar_lea.vmem [#allocation7], %s592_s25  ;;  %s606_s27 = sshll.u32 %s834_s13, 9 }
  0x3b   : > { %v275_v1 = vld [vmem:[%s946_s26] sm:$0xff]  ;;  %v276_v4 = vld [vmem:[%s946_s26 + $0x8] sm:$0xff]  ;;  %v213_v5 = vld [vmem:[%s939_s14 + $0x10] sm:$0xff]  ;;  %s480_s8 = scalar_lea.hbm %s1182_s2, %s606_s27  ;;  %s481_s16 = sshll.u32 %s961_s20, 4  ;;  %s482_s16 = int_to_ptr.vmem [resolvable:$true] %s481_s16 }
  0x3c   : > { %v339_v3 = vadd.f32 %v275_v1, %v211_v0  ;;  %v277_v6 = vld [vmem:[%s946_s26 + $0x10] sm:$0xff]  ;;  %v340_v7 = vadd.f32 %v276_v4, %v212_v2  ;;  %v214_v9 = vld [vmem:[%s939_s14 + $0x18] sm:$0xff]  ;;  %v215_v11 = vld [vmem:[%s939_s14 + $0x20] sm:$0xff]  ;;  %s483_s17 = sshll.u32 %s480_s8, 4  ;;  %s468_s19 = scalar_lea.sflag [#allocation4], %s935_s23  ;;  %s484_s17 = int_to_ptr.hbm [resolvable:$true] %s483_s17 }
  0x3d   : > { %v341_v8 = vadd.f32 %v277_v6, %v213_v5  ;;  %v278_v10 = vld [vmem:[%s946_s26 + $0x18] sm:$0xff]  ;;  %v279_v13 = vld [vmem:[%s946_s26 + $0x20] sm:$0xff]  ;;  %v216_v14 = vld [vmem:[%s939_s14 + $0x28] sm:$0xff]  ;;  %s736_s29 = sshra.s32 %s484_s17, 4  ;;  %s742_s24 = scalar_lea.hbm %s1182_s2, 1024  ;;  %s737_s29 = int_to_ptr.hbm [resolvable:$true] %s736_s29 }
  0x3e   : > { %403 = vst [vmem:[%s961_s20] sm:$0xff] %v339_v3  ;;  %v342_v12 = vadd.f32 %v278_v10, %v214_v9  ;;  %v280_v15 = vld [vmem:[%s946_s26 + $0x28] sm:$0xff]  ;;  %v343_v16 = vadd.f32 %v279_v13, %v215_v11  ;;  %v217_v18 = vld [vmem:[%s939_s14 + $0x30] sm:$0xff]  ;;  %v218_v20 = vld [vmem:[%s939_s14 + $0x38] sm:$0xff]  ;;  %s738_s3 = scalar_lea.hbm %s737_s29, 512  ;;  %p743_p10 = scmp.lt.s32.totalorder %s737_s29, %s1182_s2 }
  0x3f   : > { %404 = vst [vmem:[%s961_s20 + $0x8] sm:$0xff] %v340_v7  ;;  %v344_v17 = vadd.f32 %v280_v15, %v216_v14  ;;  %v281_v19 = vld [vmem:[%s946_s26 + $0x30] sm:$0xff]  ;;  %v282_v22 = vld [vmem:[%s946_s26 + $0x38] sm:$0xff]  ;;  %v219_v23 = vld [vmem:[%s939_s14 + $0x40] sm:$0xff]  ;;  %p739_p6 = scmp.ne.s32.totalorder %s737_s29, %s738_s3  ;;  %p744_p2 = scmp.lt.s32.totalorder %s742_s24, %s738_s3 }
  0x40   : > { %405 = vst [vmem:[%s961_s20 + $0x10] sm:$0xff] %v341_v8  ;;  %v345_v21 = vadd.f32 %v281_v19, %v217_v18  ;;  %v283_v24 = vld [vmem:[%s946_s26 + $0x40] sm:$0xff]  ;;  %v346_v25 = vadd.f32 %v282_v22, %v218_v20  ;;  %v220_v26 = vld [vmem:[%s939_s14 + $0x48] sm:$0xff]  ;;  %v221_v28 = vld [vmem:[%s939_s14 + $0x50] sm:$0xff] }
  0x41   : > { %406 = vst [vmem:[%s961_s20 + $0x18] sm:$0xff] %v342_v12  ;;  %v284_v27 = vld [vmem:[%s946_s26 + $0x48] sm:$0xff]  ;;  %v347_v29 = vadd.f32 %v283_v24, %v219_v23  ;;  %v285_v30 = vld [vmem:[%s946_s26 + $0x50] sm:$0xff]  ;;  %v222_v31 = vld [vmem:[%s939_s14 + $0x58] sm:$0xff]  ;;  %p740_p13 = pnand %p739_p6, %p863_p11  ;;  %p745_p9 = por %p744_p2, %p743_p10 }
  0x42   : > { %407 = vst [vmem:[%s961_s20 + $0x20] sm:$0xff] %v343_v16  ;;  %v286_v32 = vld [vmem:[%s946_s26 + $0x58] sm:$0xff]  ;;  %v348_v33 = vadd.f32 %v284_v27, %v220_v26  ;;  %v223_v34 = vld [vmem:[%s939_s14 + $0x60] sm:$0xff]  ;;  %v349_v36 = vadd.f32 %v285_v30, %v221_v28  ;;  %v224_v37 = vld [vmem:[%s939_s14 + $0x68] sm:$0xff] }
  0x43   : > { %408 = vst [vmem:[%s961_s20 + $0x28] sm:$0xff] %v344_v17  ;;  %v287_v35 = vld [vmem:[%s946_s26 + $0x60] sm:$0xff]  ;;  %v288_v38 = vld [vmem:[%s946_s26 + $0x68] sm:$0xff]  ;;  %v350_v39 = vadd.f32 %v286_v32, %v222_v31  ;;  %v225_v40 = vld [vmem:[%s939_s14 + $0x70] sm:$0xff]  ;;  %p741_p3 = pneg %p740_p13 }
  0x44   : > { %409 = vst [vmem:[%s961_s20 + $0x30] sm:$0xff] %v345_v21  ;;  %v289_v41 = vld [vmem:[%s946_s26 + $0x70] sm:$0xff]  ;;  %v351_v42 = vadd.f32 %v287_v35, %v223_v34  ;;  %v226_v43 = vld [vmem:[%s939_s14 + $0x78] sm:$0xff]  ;;  %v352_v45 = vadd.f32 %v288_v38, %v224_v37  ;;  %v227_v46 = vld [vmem:[%s939_s14 + $0x80] sm:$0xff] }
  0x45   : > { %410 = vst [vmem:[%s961_s20 + $0x38] sm:$0xff] %v346_v25  ;;  %v290_v44 = vld [vmem:[%s946_s26 + $0x78] sm:$0xff]  ;;  %v291_v47 = vld [vmem:[%s946_s26 + $0x80] sm:$0xff]  ;;  %v353_v48 = vadd.f32 %v289_v41, %v225_v40  ;;  %v228_v49 = vld [vmem:[%s939_s14 + $0x88] sm:$0xff]  ;;  %p746_p0 = pnand %p745_p9, %p741_p3 }
  0x46   : > { %411 = vst [vmem:[%s961_s20 + $0x40] sm:$0xff] %v347_v29  ;;  %v292_v50 = vld [vmem:[%s946_s26 + $0x88] sm:$0xff]  ;;  %v354_v51 = vadd.f32 %v290_v44, %v226_v43  ;;  %v229_v52 = vld [vmem:[%s939_s14 + $0x90] sm:$0xff]  ;;  %v355_v54 = vadd.f32 %v291_v47, %v227_v46  ;;  %v230_v55 = vld [vmem:[%s939_s14 + $0x98] sm:$0xff] }
  0x47   : > { %412 = vst [vmem:[%s961_s20 + $0x48] sm:$0xff] %v348_v33  ;;  %v293_v53 = vld [vmem:[%s946_s26 + $0x90] sm:$0xff]  ;;  %v294_v56 = vld [vmem:[%s946_s26 + $0x98] sm:$0xff]  ;;  %v356_v57 = vadd.f32 %v292_v50, %v228_v49  ;;  %v231_v58 = vld [vmem:[%s939_s14 + $0xa0] sm:$0xff] }
  0x48   : > { %413 = vst [vmem:[%s961_s20 + $0x50] sm:$0xff] %v349_v36  ;;  %v295_v59 = vld [vmem:[%s946_s26 + $0xa0] sm:$0xff]  ;;  %v357_v60 = vadd.f32 %v293_v53, %v229_v52  ;;  %v232_v61 = vld [vmem:[%s939_s14 + $0xa8] sm:$0xff]  ;;  %v358_v63 = vadd.f32 %v294_v56, %v230_v55  ;;  %v233_v0 = vld [vmem:[%s939_s14 + $0xb0] sm:$0xff] }
  0x49   : > { %414 = vst [vmem:[%s961_s20 + $0x58] sm:$0xff] %v350_v39  ;;  %v296_v62 = vld [vmem:[%s946_s26 + $0xa8] sm:$0xff]  ;;  %v297_v1 = vld [vmem:[%s946_s26 + $0xb0] sm:$0xff]  ;;  %v359_v2 = vadd.f32 %v295_v59, %v231_v58  ;;  %v234_v3 = vld [vmem:[%s939_s14 + $0xb8] sm:$0xff] }
  0x4a   : > { %415 = vst [vmem:[%s961_s20 + $0x60] sm:$0xff] %v351_v42  ;;  %v298_v4 = vld [vmem:[%s946_s26 + $0xb8] sm:$0xff]  ;;  %v360_v5 = vadd.f32 %v296_v62, %v232_v61  ;;  %v235_v6 = vld [vmem:[%s939_s14 + $0xc0] sm:$0xff]  ;;  %v361_v8 = vadd.f32 %v297_v1, %v233_v0  ;;  %v236_v9 = vld [vmem:[%s939_s14 + $0xc8] sm:$0xff] }
  0x4b   : > { %416 = vst [vmem:[%s961_s20 + $0x68] sm:$0xff] %v352_v45  ;;  %v299_v7 = vld [vmem:[%s946_s26 + $0xc0] sm:$0xff]  ;;  %v300_v10 = vld [vmem:[%s946_s26 + $0xc8] sm:$0xff]  ;;  %v362_v11 = vadd.f32 %v298_v4, %v234_v3  ;;  %v237_v12 = vld [vmem:[%s939_s14 + $0xd0] sm:$0xff] }
  0x4c   : > { %417 = vst [vmem:[%s961_s20 + $0x70] sm:$0xff] %v353_v48  ;;  %v301_v13 = vld [vmem:[%s946_s26 + $0xd0] sm:$0xff]  ;;  %v363_v14 = vadd.f32 %v299_v7, %v235_v6  ;;  %v238_v15 = vld [vmem:[%s939_s14 + $0xd8] sm:$0xff]  ;;  %v364_v17 = vadd.f32 %v300_v10, %v236_v9  ;;  %v239_v18 = vld [vmem:[%s939_s14 + $0xe0] sm:$0xff] }
  0x4d   : > { %418 = vst [vmem:[%s961_s20 + $0x78] sm:$0xff] %v354_v51  ;;  %v302_v16 = vld [vmem:[%s946_s26 + $0xd8] sm:$0xff]  ;;  %v303_v19 = vld [vmem:[%s946_s26 + $0xe0] sm:$0xff]  ;;  %v365_v20 = vadd.f32 %v301_v13, %v237_v12  ;;  %v240_v21 = vld [vmem:[%s939_s14 + $0xe8] sm:$0xff] }
  0x4e   : > { %419 = vst [vmem:[%s961_s20 + $0x80] sm:$0xff] %v355_v54  ;;  %v304_v22 = vld [vmem:[%s946_s26 + $0xe8] sm:$0xff]  ;;  %v366_v23 = vadd.f32 %v302_v16, %v238_v15  ;;  %v241_v24 = vld [vmem:[%s939_s14 + $0xf0] sm:$0xff]  ;;  %v367_v26 = vadd.f32 %v303_v19, %v239_v18  ;;  %v242_v27 = vld [vmem:[%s939_s14 + $0xf8] sm:$0xff] }
  0x4f   : > { %420 = vst [vmem:[%s961_s20 + $0x88] sm:$0xff] %v356_v57  ;;  %v305_v25 = vld [vmem:[%s946_s26 + $0xf0] sm:$0xff]  ;;  %v306_v28 = vld [vmem:[%s946_s26 + $0xf8] sm:$0xff]  ;;  %v368_v29 = vadd.f32 %v304_v22, %v240_v21  ;;  %v243_v30 = vld [vmem:[%s939_s14 + $0x100] sm:$0xff] }
  0x50   : > { %421 = vst [vmem:[%s961_s20 + $0x90] sm:$0xff] %v357_v60  ;;  %v307_v31 = vld [vmem:[%s946_s26 + $0x100] sm:$0xff]  ;;  %v369_v32 = vadd.f32 %v305_v25, %v241_v24  ;;  %v244_v33 = vld [vmem:[%s939_s14 + $0x108] sm:$0xff]  ;;  %v370_v35 = vadd.f32 %v306_v28, %v242_v27  ;;  %v245_v36 = vld [vmem:[%s939_s14 + $0x110] sm:$0xff] }
  0x51   : > { %422 = vst [vmem:[%s961_s20 + $0x98] sm:$0xff] %v358_v63  ;;  %v308_v34 = vld [vmem:[%s946_s26 + $0x108] sm:$0xff]  ;;  %v309_v37 = vld [vmem:[%s946_s26 + $0x110] sm:$0xff]  ;;  %v371_v38 = vadd.f32 %v307_v31, %v243_v30  ;;  %v246_v39 = vld [vmem:[%s939_s14 + $0x118] sm:$0xff] }
  0x52   : > { %423 = vst [vmem:[%s961_s20 + $0xa0] sm:$0xff] %v359_v2  ;;  %v310_v40 = vld [vmem:[%s946_s26 + $0x118] sm:$0xff]  ;;  %v372_v41 = vadd.f32 %v308_v34, %v244_v33  ;;  %v247_v42 = vld [vmem:[%s939_s14 + $0x120] sm:$0xff]  ;;  %v373_v44 = vadd.f32 %v309_v37, %v245_v36  ;;  %v248_v45 = vld [vmem:[%s939_s14 + $0x128] sm:$0xff] }
  0x53   : > { %424 = vst [vmem:[%s961_s20 + $0xa8] sm:$0xff] %v360_v5  ;;  %v311_v43 = vld [vmem:[%s946_s26 + $0x120] sm:$0xff]  ;;  %v312_v46 = vld [vmem:[%s946_s26 + $0x128] sm:$0xff]  ;;  %v374_v47 = vadd.f32 %v310_v40, %v246_v39  ;;  %v249_v48 = vld [vmem:[%s939_s14 + $0x130] sm:$0xff] }
  0x54   : > { %425 = vst [vmem:[%s961_s20 + $0xb0] sm:$0xff] %v361_v8  ;;  %v313_v49 = vld [vmem:[%s946_s26 + $0x130] sm:$0xff]  ;;  %v375_v50 = vadd.f32 %v311_v43, %v247_v42  ;;  %v250_v51 = vld [vmem:[%s939_s14 + $0x138] sm:$0xff]  ;;  %v376_v53 = vadd.f32 %v312_v46, %v248_v45  ;;  %v251_v54 = vld [vmem:[%s939_s14 + $0x140] sm:$0xff] }
  0x55   : > { %426 = vst [vmem:[%s961_s20 + $0xb8] sm:$0xff] %v362_v11  ;;  %v314_v52 = vld [vmem:[%s946_s26 + $0x138] sm:$0xff]  ;;  %v315_v55 = vld [vmem:[%s946_s26 + $0x140] sm:$0xff]  ;;  %v377_v56 = vadd.f32 %v313_v49, %v249_v48  ;;  %v252_v57 = vld [vmem:[%s939_s14 + $0x148] sm:$0xff] }
  0x56   : > { %427 = vst [vmem:[%s961_s20 + $0xc0] sm:$0xff] %v363_v14  ;;  %v316_v58 = vld [vmem:[%s946_s26 + $0x148] sm:$0xff]  ;;  %v378_v59 = vadd.f32 %v314_v52, %v250_v51  ;;  %v253_v60 = vld [vmem:[%s939_s14 + $0x150] sm:$0xff]  ;;  %v379_v62 = vadd.f32 %v315_v55, %v251_v54  ;;  %v254_v63 = vld [vmem:[%s939_s14 + $0x158] sm:$0xff] }
  0x57   : > { %428 = vst [vmem:[%s961_s20 + $0xc8] sm:$0xff] %v364_v17  ;;  %v317_v61 = vld [vmem:[%s946_s26 + $0x150] sm:$0xff]  ;;  %v318_v0 = vld [vmem:[%s946_s26 + $0x158] sm:$0xff]  ;;  %v380_v1 = vadd.f32 %v316_v58, %v252_v57  ;;  %v255_v2 = vld [vmem:[%s939_s14 + $0x160] sm:$0xff] }
  0x58   : > { %429 = vst [vmem:[%s961_s20 + $0xd0] sm:$0xff] %v365_v20  ;;  %v319_v3 = vld [vmem:[%s946_s26 + $0x160] sm:$0xff]  ;;  %v381_v4 = vadd.f32 %v317_v61, %v253_v60  ;;  %v256_v5 = vld [vmem:[%s939_s14 + $0x168] sm:$0xff]  ;;  %v382_v7 = vadd.f32 %v318_v0, %v254_v63  ;;  %v257_v8 = vld [vmem:[%s939_s14 + $0x170] sm:$0xff] }
  0x59   : > { %430 = vst [vmem:[%s961_s20 + $0xd8] sm:$0xff] %v366_v23  ;;  %v320_v6 = vld [vmem:[%s946_s26 + $0x168] sm:$0xff]  ;;  %v321_v9 = vld [vmem:[%s946_s26 + $0x170] sm:$0xff]  ;;  %v383_v10 = vadd.f32 %v319_v3, %v255_v2  ;;  %v258_v11 = vld [vmem:[%s939_s14 + $0x178] sm:$0xff] }
  0x5a   : > { %431 = vst [vmem:[%s961_s20 + $0xe0] sm:$0xff] %v367_v26  ;;  %v322_v12 = vld [vmem:[%s946_s26 + $0x178] sm:$0xff]  ;;  %v384_v13 = vadd.f32 %v320_v6, %v256_v5  ;;  %v259_v14 = vld [vmem:[%s939_s14 + $0x180] sm:$0xff]  ;;  %v385_v16 = vadd.f32 %v321_v9, %v257_v8  ;;  %v260_v17 = vld [vmem:[%s939_s14 + $0x188] sm:$0xff] }
  0x5b   : > { %432 = vst [vmem:[%s961_s20 + $0xe8] sm:$0xff] %v368_v29  ;;  %v323_v15 = vld [vmem:[%s946_s26 + $0x180] sm:$0xff]  ;;  %v324_v18 = vld [vmem:[%s946_s26 + $0x188] sm:$0xff]  ;;  %v386_v19 = vadd.f32 %v322_v12, %v258_v11  ;;  %v261_v20 = vld [vmem:[%s939_s14 + $0x190] sm:$0xff] }
  0x5c   : > { %433 = vst [vmem:[%s961_s20 + $0xf0] sm:$0xff] %v369_v32  ;;  %v325_v21 = vld [vmem:[%s946_s26 + $0x190] sm:$0xff]  ;;  %v387_v22 = vadd.f32 %v323_v15, %v259_v14  ;;  %v262_v23 = vld [vmem:[%s939_s14 + $0x198] sm:$0xff]  ;;  %v388_v25 = vadd.f32 %v324_v18, %v260_v17  ;;  %v263_v26 = vld [vmem:[%s939_s14 + $0x1a0] sm:$0xff] }
  0x5d   : > { %434 = vst [vmem:[%s961_s20 + $0xf8] sm:$0xff] %v370_v35  ;;  %v326_v24 = vld [vmem:[%s946_s26 + $0x198] sm:$0xff]  ;;  %v327_v27 = vld [vmem:[%s946_s26 + $0x1a0] sm:$0xff]  ;;  %v389_v28 = vadd.f32 %v325_v21, %v261_v20  ;;  %v264_v29 = vld [vmem:[%s939_s14 + $0x1a8] sm:$0xff] }
  0x5e   : > { %435 = vst [vmem:[%s961_s20 + $0x100] sm:$0xff] %v371_v38  ;;  %v328_v30 = vld [vmem:[%s946_s26 + $0x1a8] sm:$0xff]  ;;  %v390_v31 = vadd.f32 %v326_v24, %v262_v23  ;;  %v265_v32 = vld [vmem:[%s939_s14 + $0x1b0] sm:$0xff]  ;;  %v391_v34 = vadd.f32 %v327_v27, %v263_v26  ;;  %v266_v35 = vld [vmem:[%s939_s14 + $0x1b8] sm:$0xff] }
  0x5f   : > { %436 = vst [vmem:[%s961_s20 + $0x108] sm:$0xff] %v372_v41  ;;  %v329_v33 = vld [vmem:[%s946_s26 + $0x1b0] sm:$0xff]  ;;  %v330_v36 = vld [vmem:[%s946_s26 + $0x1b8] sm:$0xff]  ;;  %v392_v37 = vadd.f32 %v328_v30, %v264_v29  ;;  %v267_v38 = vld [vmem:[%s939_s14 + $0x1c0] sm:$0xff] }
  0x60   : > { %437 = vst [vmem:[%s961_s20 + $0x110] sm:$0xff] %v373_v44  ;;  %v331_v39 = vld [vmem:[%s946_s26 + $0x1c0] sm:$0xff]  ;;  %v393_v40 = vadd.f32 %v329_v33, %v265_v32  ;;  %v268_v41 = vld [vmem:[%s939_s14 + $0x1c8] sm:$0xff]  ;;  %v394_v43 = vadd.f32 %v330_v36, %v266_v35  ;;  %v269_v44 = vld [vmem:[%s939_s14 + $0x1d0] sm:$0xff] }
  0x61   : > { %438 = vst [vmem:[%s961_s20 + $0x118] sm:$0xff] %v374_v47  ;;  %v332_v42 = vld [vmem:[%s946_s26 + $0x1c8] sm:$0xff]  ;;  %v333_v45 = vld [vmem:[%s946_s26 + $0x1d0] sm:$0xff]  ;;  %v395_v46 = vadd.f32 %v331_v39, %v267_v38  ;;  %v270_v47 = vld [vmem:[%s939_s14 + $0x1d8] sm:$0xff] }
  0x62   : > { %439 = vst [vmem:[%s961_s20 + $0x120] sm:$0xff] %v375_v50  ;;  %v334_v48 = vld [vmem:[%s946_s26 + $0x1d8] sm:$0xff]  ;;  %v396_v49 = vadd.f32 %v332_v42, %v268_v41  ;;  %v271_v50 = vld [vmem:[%s939_s14 + $0x1e0] sm:$0xff]  ;;  %v397_v52 = vadd.f32 %v333_v45, %v269_v44  ;;  %v336_v54 = vld [vmem:[%s946_s26 + $0x1e8] sm:$0xff] }
  0x63   : > { %440 = vst [vmem:[%s961_s20 + $0x128] sm:$0xff] %v376_v53  ;;  %v335_v51 = vld [vmem:[%s946_s26 + $0x1e0] sm:$0xff]  ;;  %v272_v53 = vld [vmem:[%s939_s14 + $0x1e8] sm:$0xff]  ;;  %v398_v55 = vadd.f32 %v334_v48, %v270_v47  ;;  %v337_v57 = vld [vmem:[%s946_s26 + $0x1f0] sm:$0xff] }
  0x64   : > { %441 = vst [vmem:[%s961_s20 + $0x130] sm:$0xff] %v377_v56  ;;  %v273_v56 = vld [vmem:[%s939_s14 + $0x1f0] sm:$0xff]  ;;  %v399_v58 = vadd.f32 %v335_v51, %v271_v50  ;;  %v338_v60 = vld [vmem:[%s946_s26 + $0x1f8] sm:$0xff]  ;;  %v400_v61 = vadd.f32 %v336_v54, %v272_v53 }
  0x65   : > { %442 = vst [vmem:[%s961_s20 + $0x138] sm:$0xff] %v378_v59  ;;  %v274_v59 = vld [vmem:[%s939_s14 + $0x1f8] sm:$0xff] }
  0x66   : > { %443 = vst [vmem:[%s961_s20 + $0x140] sm:$0xff] %v379_v62  ;;  %v401_v62 = vadd.f32 %v337_v57, %v273_v56  ;;  %v402_v63 = vadd.f32 %v338_v60, %v274_v59 }
  0x67   : > { %444 = vst [vmem:[%s961_s20 + $0x148] sm:$0xff] %v380_v1 }
  0x68   : > { %445 = vst [vmem:[%s961_s20 + $0x150] sm:$0xff] %v381_v4 }
  0x69   : > { %446 = vst [vmem:[%s961_s20 + $0x158] sm:$0xff] %v382_v7 }
  0x6a   : > { %447 = vst [vmem:[%s961_s20 + $0x160] sm:$0xff] %v383_v10 }
  0x6b   : > { %448 = vst [vmem:[%s961_s20 + $0x168] sm:$0xff] %v384_v13 }
  0x6c   : > { %449 = vst [vmem:[%s961_s20 + $0x170] sm:$0xff] %v385_v16 }
  0x6d   : > { %450 = vst [vmem:[%s961_s20 + $0x178] sm:$0xff] %v386_v19 }
  0x6e   : > { %451 = vst [vmem:[%s961_s20 + $0x180] sm:$0xff] %v387_v22 }
  0x6f   : > { %452 = vst [vmem:[%s961_s20 + $0x188] sm:$0xff] %v388_v25 }
  0x70   : > { %453 = vst [vmem:[%s961_s20 + $0x190] sm:$0xff] %v389_v28 }
  0x71   : > { %454 = vst [vmem:[%s961_s20 + $0x198] sm:$0xff] %v390_v31 }
  0x72   : > { %455 = vst [vmem:[%s961_s20 + $0x1a0] sm:$0xff] %v391_v34 }
  0x73   : > { %456 = vst [vmem:[%s961_s20 + $0x1a8] sm:$0xff] %v392_v37 }
  0x74   : > { %457 = vst [vmem:[%s961_s20 + $0x1b0] sm:$0xff] %v393_v40 }
  0x75   : > { %458 = vst [vmem:[%s961_s20 + $0x1b8] sm:$0xff] %v394_v43 }
  0x76   : > { %459 = vst [vmem:[%s961_s20 + $0x1c0] sm:$0xff] %v395_v46 }
  0x77   : > { %460 = vst [vmem:[%s961_s20 + $0x1c8] sm:$0xff] %v396_v49 }
  0x78   : > { %461 = vst [vmem:[%s961_s20 + $0x1d0] sm:$0xff] %v397_v52 }
  0x79   : > { %462 = vst [vmem:[%s961_s20 + $0x1d8] sm:$0xff] %v398_v55 }
  0x7a   : > { %463 = vst [vmem:[%s961_s20 + $0x1e0] sm:$0xff] %v399_v58 }
  0x7b   : > { %464 = vst [vmem:[%s961_s20 + $0x1e8] sm:$0xff] %v400_v61 }
  0x7c   : > { %465 = vst [vmem:[%s961_s20 + $0x1f0] sm:$0xff] %v401_v62 }
  0x7d   : > { %466 = vst [vmem:[%s961_s20 + $0x1f8] sm:$0xff] %v402_v63 }
  0x7e   : > { %749 = shalt.err (!%p746_p0)
}
  0x7f   : > { %s796_s23 = smov 1024   ;;  %s797_s7 = smov 64  }
  0x80   : > { %611 = dma.vmem_to_hbm [thread:$0]  (%p863_p11), %s482_s16, 8192, %s484_s17, %s468_s19, %s796_s23, %s796_s23, %s797_s7  }
  0x81 PF: > { %s498_s14 = sand.u32 1, %s780_s9   ;;  %p1189_p1 = scmp.ge.s32.totalorder %s792_s12, 2 }
  0x82   : > { %s499_s4 = scalar_lea.sflag [#allocation4], %s498_s14 }
  0x83   : > { %p621_p4 = pnand %p1189_p1, %p867_p12 }
  0x85   : > { %p622_p7 = pneg %p621_p4 }
  0x87   : > { %775 = dma.done.wait (%p622_p7), %s499_s4, 8192  }
  0x88   : > { %777 = vsyncadd (%p622_p7), %s499_s4, 4294959104  ;;  %p18_p5 = scmp.ge.s32.totalorder %s838_s15, 4   ;;  %s1190_s9 = smov %s784_s10 }
  0x89   : > { %s1191_s10 = smov %s788_s11  ;;  %s1192_s11 = smov %s850_s18 }
  0x8a   : > { %s1193_s12 = smov %s838_s15  ;;  %20 = sbr.rel (!%p18_p5) target bundleno = 7 (0x7), region = 86 }
  0x8f   :  { %505 = vsyncpa [#allocation3], 1 }
  0x90   :  { %507 = vsyncpa [#allocation3 + $0x1], 1 }
  0x91   :  { %508 = vsyncpa [#allocation6], 1 }
  0x92   :  { %510 = vsyncpa [#allocation6 + $0x1], 1 }
  0x93   :  { %511 = vsyncpa [#allocation4], 1 }
  0x94   :  { %513 = vsyncpa [#allocation4 + $0x1], 1 }

</bundles_post_ra>
